<compile_context>
chip_gen: v6e
topology: v6e:2x2x1
jax: 0.10.0
libtpu: 0.0.40
codegen_flags: <defaults>
</compile_context>

<pallas_src>
import functools

import jax
import jax.numpy as jnp
from jax import lax
from jax.experimental import pallas as pl
from jax.experimental.pallas import tpu as pltpu


def _round_up(n, m):
    return ((n + m - 1) // m) * m


def _pad2(a, rows, cols):
    return jnp.pad(a, ((0, rows - a.shape[0]), (0, cols - a.shape[1])))


def rnn_classify_kernel(tok_ref, fused_ref, whhT_ref, wclsT_ref, bcls_ref,
                        y_ref, xw_scr):
    """Gather fused embeddings + Elman recurrence + classifier, all in VMEM.

    tok_ref   : (B, S)      int32 token ids (SMEM, scalar-prefetched)
    fused_ref : (Vp, Dp)    f32 fused table: emb @ W_ih^T + b_ih + b_hh
    whhT_ref  : (Dp, Dp)    bf16 W_hh^T
    wclsT_ref : (Dp, Cp)    bf16 classifier W^T
    bcls_ref  : (1, Cp)     f32 classifier bias
    y_ref     : (Bp, Cp)    f32 output logits (padded; wrapper slices)
    xw_scr    : (S*Bp, Dp)  f32 scratch: per-step input pre-activations
    """
    bp = y_ref.shape[0]
    dp = fused_ref.shape[1]
    batch, seq_len = tok_ref.shape

    # ---- gather (off the serial chain): one fused-table row per (t, b).
    # Padded batch rows stay exactly 0 (the bias lives in the table rows, so
    # padded rows never pick it up and padded h rows remain 0 through tanh).
    xw_scr[...] = jnp.zeros_like(xw_scr)
    for t in range(seq_len):
        for b in range(batch):
            tok = tok_ref[b, t]                              # SMEM scalar read
            xw_scr[pl.ds(t * bp + b, 1), :] = fused_ref[pl.ds(tok, 1), :]

    # Hoisted load: read the recurrent weight once, reuse every step.
    whhT = whhT_ref[...]                                     # (Dp, Dp) bf16

    # TODO(synk): hold W_hh^T in the MXU weight staging across the unrolled
    # recurrence (pltpu.matmul_push_rhs once + matmul_acc_lhs/matmul_pop per
    # step) to drop the per-step weight push from the serial latency chain;
    # kept as jnp.dot here for portable, guaranteed lowering on v5e/v6e/v7x.
    h = jnp.zeros((bp, dp), jnp.float32)                     # h_0 = 0 (PyTorch default)
    for t in range(seq_len):                                 # fully unrolled (static S)
        xw_t = xw_scr[pl.ds(t * bp, bp), :]                  # (Bp, Dp) f32, aligned tile
        h = jnp.tanh(
            xw_t + jnp.dot(h.astype(whhT.dtype), whhT,
                           preferred_element_type=jnp.float32))

    # classifier: lane-dense (Bp, Cp) store
    y_ref[...] = (
        jnp.dot(h.astype(wclsT_ref.dtype), wclsT_ref[...],
                preferred_element_type=jnp.float32)
        + bcls_ref[...]
    )


def prepare_params(params):
    """One-time weight preparation (run once per model, NOT per forward call).

    Fuses embedding + input projection + both RNN biases, pre-transposes the
    remaining weights, pads to MXU/vreg-friendly sizes and casts the matmul
    operands to bf16.
    """
    hp = lax.Precision.HIGHEST
    emb = params["embedding"].astype(jnp.float32)            # (V, D), row 0 = pad
    w_ih = params["w_ih"].astype(jnp.float32)                # (D, D)
    w_hh = params["w_hh"].astype(jnp.float32)                # (D, D)
    b = (params["b_ih"] + params["b_hh"]).astype(jnp.float32)
    w_cls = params["w_cls"].astype(jnp.float32)              # (C, D)
    b_cls = params["b_cls"].astype(jnp.float32)              # (C,)

    V, D = emb.shape
    C = w_cls.shape[0]
    dp = _round_up(D, 128)      # lane dims -> multiples of 128
    cp = _round_up(C, 128)
    vp = _round_up(V, 8)        # sublane dim -> multiple of 8

    # fused[v] = emb[v] @ W_ih^T + b_ih + b_hh   (full f32 precision, once)
    fused = jnp.dot(emb, w_ih.T, precision=hp) + b           # (V, D)

    return {
        "fused": _pad2(fused, vp, dp),                              # f32 (Vp, Dp)
        "whhT": _pad2(w_hh.T, dp, dp).astype(jnp.bfloat16),         # bf16 (Dp, Dp)
        "wclsT": _pad2(w_cls.T, dp, cp).astype(jnp.bfloat16),       # bf16 (Dp, Cp)
        "bcls": _pad2(b_cls.reshape(1, C), 1, cp),                  # f32 (1, Cp)
    }


@functools.partial(jax.jit, static_argnames=("out_features",))
def nlp_multi_classification_forward(tokens, prepared, *, out_features):
    """Pallas equivalent of NlpMultiClassificationModule.forward (y=None)."""
    B, S = tokens.shape
    vp, dp = prepared["fused"].shape
    cp = prepared["bcls"].shape[1]
    bp = _round_up(B, 8)

    # NOTE: at realistic S, tile the grid over S-chunks (h carried in scratch,
    # init under pl.when(program_id==0), axis "arbitrary") so the x block stays
    # well under v7x's 64 MiB VMEM; at realistic B on v7x, add a leading
    # "parallel" grid axis over batch chunks (multiples of 8 sublanes) so both
    # TensorCores get work.  At these toy sizes a single resident block wins.
    y_pad = pl.pallas_call(
        rnn_classify_kernel,
        out_shape=jax.ShapeDtypeStruct((bp, cp), jnp.float32),
        grid_spec=pltpu.PrefetchScalarGridSpec(
            num_scalar_prefetch=1,               # tokens -> SMEM
            grid=(1,),
            in_specs=[
                pl.BlockSpec((vp, dp), lambda i, tok: (0, 0)),  # fused table
                pl.BlockSpec((dp, dp), lambda i, tok: (0, 0)),  # W_hh^T
                pl.BlockSpec((dp, cp), lambda i, tok: (0, 0)),  # W_cls^T
                pl.BlockSpec((1, cp), lambda i, tok: (0, 0)),   # classifier bias
            ],
            out_specs=pl.BlockSpec((bp, cp), lambda i, tok: (0, 0)),
            scratch_shapes=[pltpu.VMEM((S * bp, dp), jnp.float32)],
        ),
        compiler_params=pltpu.CompilerParams(
            dimension_semantics=("arbitrary",)),
    )(tokens.astype(jnp.int32), prepared["fused"], prepared["whhT"],
      prepared["wclsT"], prepared["bcls"])

    return y_pad[:B, :out_features]


def init_params(key, vocab_size, vector_dim, out_features):
    """Deterministic parameter init (shapes match the PyTorch module)."""
    ks = jax.random.split(key, 7)
    bound = 1.0 / jnp.sqrt(vector_dim)

    emb = jax.random.normal(ks[0], (vocab_size, vector_dim), jnp.float32)
    emb = emb.at[0].set(0.0)  # padding_idx=0

    u = lambda k, shp: jax.random.uniform(k, shp, jnp.float32, -bound, bound)
    return {
        "embedding": emb,
        "w_ih": u(ks[1], (vector_dim, vector_dim)),
        "w_hh": u(ks[2], (vector_dim, vector_dim)),
        "b_ih": u(ks[3], (vector_dim,)),
        "b_hh": u(ks[4], (vector_dim,)),
        "w_cls": u(ks[5], (out_features, vector_dim)),
        "b_cls": u(ks[6], (out_features,)),
    }


def reference_forward(tokens, params, recur_matmul_dtype=jnp.float32):
    """Pure-JAX reference of the forward pass.

    recur_matmul_dtype=float32  -> true f32 module numerics.
    recur_matmul_dtype=bfloat16 -> mirrors the kernel's MXU input precision
                                   (f32 accumulation either way).
    """
    hp = lax.Precision.HIGHEST
    x = jnp.take(params["embedding"], tokens, axis=0).astype(jnp.float32)
    B, S, D = x.shape
    b = (params["b_ih"] + params["b_hh"]).astype(jnp.float32)
    # Input projection always in f32 (matches the prepare-time fused table).
    xw = jnp.einsum("bsd,ed->bse", x, params["w_ih"].astype(jnp.float32),
                    precision=hp) + b
    dt = recur_matmul_dtype
    h = jnp.zeros((B, D), jnp.float32)
    for t in range(S):
        h = jnp.tanh(
            xw[:, t, :] + jnp.dot(h.astype(dt), params["w_hh"].T.astype(dt),
                                  preferred_element_type=jnp.float32,
                                  precision=hp))
    return (jnp.dot(h.astype(dt), params["w_cls"].T.astype(dt),
                    preferred_element_type=jnp.float32, precision=hp)
            + params["b_cls"].astype(jnp.float32))


if __name__ == "__main__":
    # Small shapes: vocab=28 (pad + 26 letters + unk), D=32, seq=8, batch=2,
    # 5 output classes.
    VOCAB, D, SEQ, BATCH, CLASSES = 28, 32, 8, 2, 5

    key = jax.random.PRNGKey(0)
    k_param, k_tok = jax.random.split(key)
    params = init_params(k_param, VOCAB, D, CLASSES)
    tokens = jax.random.randint(k_tok, (BATCH, SEQ), 0, VOCAB, jnp.int32)

    prepared = prepare_params(params)                 # hoisted: done once
    y_pred = nlp_multi_classification_forward(tokens, prepared,
                                              out_features=CLASSES)
    y_pred = jax.block_until_ready(y_pred)
    assert y_pred.shape == (BATCH, CLASSES)

    # Tight check vs a reference using the same (bf16-input) matmul precision.
    y_ref_match = reference_forward(tokens, params, jnp.bfloat16)
    assert jnp.allclose(y_pred, y_ref_match, atol=1e-3, rtol=1e-3), (
        "Pallas output mismatch vs precision-matched reference")

    # Semantic check vs the true f32 module numerics (bounds bf16 MXU error).
    y_ref_f32 = reference_forward(tokens, params, jnp.float32)
    assert jnp.allclose(y_pred, y_ref_f32, atol=2e-2, rtol=2e-2), (
        "Pallas output drifted from f32 reference beyond mixed-precision bound")

    print("KERNEL_OK")
</pallas_src>

<mosaic_0001>
module attributes {stable_mosaic.version = 11 : i64} {
  func.func @rnn_classify_kernel(%arg0: i32, %arg1: memref<2x8xi32, #tpu.memory_space<smem>>, %arg2: memref<32x128xf32, #tpu.memory_space<vmem>>, %arg3: memref<128x128xbf16, #tpu.memory_space<vmem>>, %arg4: memref<128x128xbf16, #tpu.memory_space<vmem>>, %arg5: memref<1x128xf32, #tpu.memory_space<vmem>>, %arg6: memref<8x128xf32, #tpu.memory_space<vmem>>, %arg7: memref<64x128xf32, #tpu.memory_space<vmem>>) attributes {dimension_semantics = [#tpu.dimension_semantics<arbitrary>], iteration_bounds = array<i64: 1>, scalar_prefetch = 1 : i64, scratch_operands = 1 : i64, tpu.core_type = #tpu.core_type<tc>, window_params = [{pipeline_mode = #tpu.pipeline_mode<synchronous>, transform_indices = @transform_0, window_bounds = array<i64: 32, 128>}, {pipeline_mode = #tpu.pipeline_mode<synchronous>, transform_indices = @transform_1, window_bounds = array<i64: 128, 128>}, {pipeline_mode = #tpu.pipeline_mode<synchronous>, transform_indices = @transform_2, window_bounds = array<i64: 128, 128>}, {pipeline_mode = #tpu.pipeline_mode<synchronous>, transform_indices = @transform_3, window_bounds = array<i64: 1, 128>}, {pipeline_mode = #tpu.pipeline_mode<synchronous>, transform_indices = @transform_4, window_bounds = array<i64: 8, 128>}]} {
    %cst = arith.constant 0.000000e+00 : f32
    %0 = vector.broadcast %cst : f32 to vector<64x128xf32>
    %c0 = arith.constant 0 : index
    %c0_0 = arith.constant 0 : index
    %1 = vector.load %arg7[%c0, %c0_0] : memref<64x128xf32, #tpu.memory_space<vmem>>, vector<64x128xf32>
    tpu.vector_store %arg7[%c0, %c0_0], %0 {strides = array<i32>} : memref<64x128xf32, #tpu.memory_space<vmem>>, vector<64x128xf32>,
    %c0_1 = arith.constant 0 : index
    %c0_2 = arith.constant 0 : index
    %2 = memref.load %arg1[%c0_1, %c0_2] : memref<2x8xi32, #tpu.memory_space<smem>>
    %3 = arith.index_cast %2 : i32 to index
    %c0_3 = arith.constant 0 : index
    %4 = vector.load %arg2[%3, %c0_3] : memref<32x128xf32, #tpu.memory_space<vmem>>, vector<1x128xf32>
    %c0_4 = arith.constant 0 : index
    %c0_5 = arith.constant 0 : index
    %5 = vector.load %arg7[%c0_4, %c0_5] : memref<64x128xf32, #tpu.memory_space<vmem>>, vector<1x128xf32>
    tpu.vector_store %arg7[%c0_4, %c0_5], %4 {strides = array<i32>} : memref<64x128xf32, #tpu.memory_space<vmem>>, vector<1x128xf32>,
    %c1 = arith.constant 1 : index
    %c0_6 = arith.constant 0 : index
    %6 = memref.load %arg1[%c1, %c0_6] : memref<2x8xi32, #tpu.memory_space<smem>>
    %7 = arith.index_cast %6 : i32 to index
    %c0_7 = arith.constant 0 : index
    %8 = vector.load %arg2[%7, %c0_7] : memref<32x128xf32, #tpu.memory_space<vmem>>, vector<1x128xf32>
    %c1_8 = arith.constant 1 : index
    %c0_9 = arith.constant 0 : index
    %9 = vector.load %arg7[%c1_8, %c0_9] : memref<64x128xf32, #tpu.memory_space<vmem>>, vector<1x128xf32>
    tpu.vector_store %arg7[%c1_8, %c0_9], %8 {strides = array<i32>} : memref<64x128xf32, #tpu.memory_space<vmem>>, vector<1x128xf32>,
    %c0_10 = arith.constant 0 : index
    %c1_11 = arith.constant 1 : index
    %10 = memref.load %arg1[%c0_10, %c1_11] : memref<2x8xi32, #tpu.memory_space<smem>>
    %11 = arith.index_cast %10 : i32 to index
    %c0_12 = arith.constant 0 : index
    %12 = vector.load %arg2[%11, %c0_12] : memref<32x128xf32, #tpu.memory_space<vmem>>, vector<1x128xf32>
    %c8 = arith.constant 8 : index
    %c0_13 = arith.constant 0 : index
    %13 = vector.load %arg7[%c8, %c0_13] : memref<64x128xf32, #tpu.memory_space<vmem>>, vector<1x128xf32>
    tpu.vector_store %arg7[%c8, %c0_13], %12 {strides = array<i32>} : memref<64x128xf32, #tpu.memory_space<vmem>>, vector<1x128xf32>,
    %c1_14 = arith.constant 1 : index
    %c1_15 = arith.constant 1 : index
    %14 = memref.load %arg1[%c1_14, %c1_15] : memref<2x8xi32, #tpu.memory_space<smem>>
    %15 = arith.index_cast %14 : i32 to index
    %c0_16 = arith.constant 0 : index
    %16 = vector.load %arg2[%15, %c0_16] : memref<32x128xf32, #tpu.memory_space<vmem>>, vector<1x128xf32>
    %c9 = arith.constant 9 : index
    %c0_17 = arith.constant 0 : index
    %17 = vector.load %arg7[%c9, %c0_17] : memref<64x128xf32, #tpu.memory_space<vmem>>, vector<1x128xf32>
    tpu.vector_store %arg7[%c9, %c0_17], %16 {strides = array<i32>} : memref<64x128xf32, #tpu.memory_space<vmem>>, vector<1x128xf32>,
    %c0_18 = arith.constant 0 : index
    %c2 = arith.constant 2 : index
    %18 = memref.load %arg1[%c0_18, %c2] : memref<2x8xi32, #tpu.memory_space<smem>>
    %19 = arith.index_cast %18 : i32 to index
    %c0_19 = arith.constant 0 : index
    %20 = vector.load %arg2[%19, %c0_19] : memref<32x128xf32, #tpu.memory_space<vmem>>, vector<1x128xf32>
    %c16 = arith.constant 16 : index
    %c0_20 = arith.constant 0 : index
    %21 = vector.load %arg7[%c16, %c0_20] : memref<64x128xf32, #tpu.memory_space<vmem>>, vector<1x128xf32>
    tpu.vector_store %arg7[%c16, %c0_20], %20 {strides = array<i32>} : memref<64x128xf32, #tpu.memory_space<vmem>>, vector<1x128xf32>,
    %c1_21 = arith.constant 1 : index
    %c2_22 = arith.constant 2 : index
    %22 = memref.load %arg1[%c1_21, %c2_22] : memref<2x8xi32, #tpu.memory_space<smem>>
    %23 = arith.index_cast %22 : i32 to index
    %c0_23 = arith.constant 0 : index
    %24 = vector.load %arg2[%23, %c0_23] : memref<32x128xf32, #tpu.memory_space<vmem>>, vector<1x128xf32>
    %c17 = arith.constant 17 : index
    %c0_24 = arith.constant 0 : index
    %25 = vector.load %arg7[%c17, %c0_24] : memref<64x128xf32, #tpu.memory_space<vmem>>, vector<1x128xf32>
    tpu.vector_store %arg7[%c17, %c0_24], %24 {strides = array<i32>} : memref<64x128xf32, #tpu.memory_space<vmem>>, vector<1x128xf32>,
    %c0_25 = arith.constant 0 : index
    %c3 = arith.constant 3 : index
    %26 = memref.load %arg1[%c0_25, %c3] : memref<2x8xi32, #tpu.memory_space<smem>>
    %27 = arith.index_cast %26 : i32 to index
    %c0_26 = arith.constant 0 : index
    %28 = vector.load %arg2[%27, %c0_26] : memref<32x128xf32, #tpu.memory_space<vmem>>, vector<1x128xf32>
    %c24 = arith.constant 24 : index
    %c0_27 = arith.constant 0 : index
    %29 = vector.load %arg7[%c24, %c0_27] : memref<64x128xf32, #tpu.memory_space<vmem>>, vector<1x128xf32>
    tpu.vector_store %arg7[%c24, %c0_27], %28 {strides = array<i32>} : memref<64x128xf32, #tpu.memory_space<vmem>>, vector<1x128xf32>,
    %c1_28 = arith.constant 1 : index
    %c3_29 = arith.constant 3 : index
    %30 = memref.load %arg1[%c1_28, %c3_29] : memref<2x8xi32, #tpu.memory_space<smem>>
    %31 = arith.index_cast %30 : i32 to index
    %c0_30 = arith.constant 0 : index
    %32 = vector.load %arg2[%31, %c0_30] : memref<32x128xf32, #tpu.memory_space<vmem>>, vector<1x128xf32>
    %c25 = arith.constant 25 : index
    %c0_31 = arith.constant 0 : index
    %33 = vector.load %arg7[%c25, %c0_31] : memref<64x128xf32, #tpu.memory_space<vmem>>, vector<1x128xf32>
    tpu.vector_store %arg7[%c25, %c0_31], %32 {strides = array<i32>} : memref<64x128xf32, #tpu.memory_space<vmem>>, vector<1x128xf32>,
    %c0_32 = arith.constant 0 : index
    %c4 = arith.constant 4 : index
    %34 = memref.load %arg1[%c0_32, %c4] : memref<2x8xi32, #tpu.memory_space<smem>>
    %35 = arith.index_cast %34 : i32 to index
    %c0_33 = arith.constant 0 : index
    %36 = vector.load %arg2[%35, %c0_33] : memref<32x128xf32, #tpu.memory_space<vmem>>, vector<1x128xf32>
    %c32 = arith.constant 32 : index
    %c0_34 = arith.constant 0 : index
    %37 = vector.load %arg7[%c32, %c0_34] : memref<64x128xf32, #tpu.memory_space<vmem>>, vector<1x128xf32>
    tpu.vector_store %arg7[%c32, %c0_34], %36 {strides = array<i32>} : memref<64x128xf32, #tpu.memory_space<vmem>>, vector<1x128xf32>,
    %c1_35 = arith.constant 1 : index
    %c4_36 = arith.constant 4 : index
    %38 = memref.load %arg1[%c1_35, %c4_36] : memref<2x8xi32, #tpu.memory_space<smem>>
    %39 = arith.index_cast %38 : i32 to index
    %c0_37 = arith.constant 0 : index
    %40 = vector.load %arg2[%39, %c0_37] : memref<32x128xf32, #tpu.memory_space<vmem>>, vector<1x128xf32>
    %c33 = arith.constant 33 : index
    %c0_38 = arith.constant 0 : index
    %41 = vector.load %arg7[%c33, %c0_38] : memref<64x128xf32, #tpu.memory_space<vmem>>, vector<1x128xf32>
    tpu.vector_store %arg7[%c33, %c0_38], %40 {strides = array<i32>} : memref<64x128xf32, #tpu.memory_space<vmem>>, vector<1x128xf32>,
    %c0_39 = arith.constant 0 : index
    %c5 = arith.constant 5 : index
    %42 = memref.load %arg1[%c0_39, %c5] : memref<2x8xi32, #tpu.memory_space<smem>>
    %43 = arith.index_cast %42 : i32 to index
    %c0_40 = arith.constant 0 : index
    %44 = vector.load %arg2[%43, %c0_40] : memref<32x128xf32, #tpu.memory_space<vmem>>, vector<1x128xf32>
    %c40 = arith.constant 40 : index
    %c0_41 = arith.constant 0 : index
    %45 = vector.load %arg7[%c40, %c0_41] : memref<64x128xf32, #tpu.memory_space<vmem>>, vector<1x128xf32>
    tpu.vector_store %arg7[%c40, %c0_41], %44 {strides = array<i32>} : memref<64x128xf32, #tpu.memory_space<vmem>>, vector<1x128xf32>,
    %c1_42 = arith.constant 1 : index
    %c5_43 = arith.constant 5 : index
    %46 = memref.load %arg1[%c1_42, %c5_43] : memref<2x8xi32, #tpu.memory_space<smem>>
    %47 = arith.index_cast %46 : i32 to index
    %c0_44 = arith.constant 0 : index
    %48 = vector.load %arg2[%47, %c0_44] : memref<32x128xf32, #tpu.memory_space<vmem>>, vector<1x128xf32>
    %c41 = arith.constant 41 : index
    %c0_45 = arith.constant 0 : index
    %49 = vector.load %arg7[%c41, %c0_45] : memref<64x128xf32, #tpu.memory_space<vmem>>, vector<1x128xf32>
    tpu.vector_store %arg7[%c41, %c0_45], %48 {strides = array<i32>} : memref<64x128xf32, #tpu.memory_space<vmem>>, vector<1x128xf32>,
    %c0_46 = arith.constant 0 : index
    %c6 = arith.constant 6 : index
    %50 = memref.load %arg1[%c0_46, %c6] : memref<2x8xi32, #tpu.memory_space<smem>>
    %51 = arith.index_cast %50 : i32 to index
    %c0_47 = arith.constant 0 : index
    %52 = vector.load %arg2[%51, %c0_47] : memref<32x128xf32, #tpu.memory_space<vmem>>, vector<1x128xf32>
    %c48 = arith.constant 48 : index
    %c0_48 = arith.constant 0 : index
    %53 = vector.load %arg7[%c48, %c0_48] : memref<64x128xf32, #tpu.memory_space<vmem>>, vector<1x128xf32>
    tpu.vector_store %arg7[%c48, %c0_48], %52 {strides = array<i32>} : memref<64x128xf32, #tpu.memory_space<vmem>>, vector<1x128xf32>,
    %c1_49 = arith.constant 1 : index
    %c6_50 = arith.constant 6 : index
    %54 = memref.load %arg1[%c1_49, %c6_50] : memref<2x8xi32, #tpu.memory_space<smem>>
    %55 = arith.index_cast %54 : i32 to index
    %c0_51 = arith.constant 0 : index
    %56 = vector.load %arg2[%55, %c0_51] : memref<32x128xf32, #tpu.memory_space<vmem>>, vector<1x128xf32>
    %c49 = arith.constant 49 : index
    %c0_52 = arith.constant 0 : index
    %57 = vector.load %arg7[%c49, %c0_52] : memref<64x128xf32, #tpu.memory_space<vmem>>, vector<1x128xf32>
    tpu.vector_store %arg7[%c49, %c0_52], %56 {strides = array<i32>} : memref<64x128xf32, #tpu.memory_space<vmem>>, vector<1x128xf32>,
    %c0_53 = arith.constant 0 : index
    %c7 = arith.constant 7 : index
    %58 = memref.load %arg1[%c0_53, %c7] : memref<2x8xi32, #tpu.memory_space<smem>>
    %59 = arith.index_cast %58 : i32 to index
    %c0_54 = arith.constant 0 : index
    %60 = vector.load %arg2[%59, %c0_54] : memref<32x128xf32, #tpu.memory_space<vmem>>, vector<1x128xf32>
    %c56 = arith.constant 56 : index
    %c0_55 = arith.constant 0 : index
    %61 = vector.load %arg7[%c56, %c0_55] : memref<64x128xf32, #tpu.memory_space<vmem>>, vector<1x128xf32>
    tpu.vector_store %arg7[%c56, %c0_55], %60 {strides = array<i32>} : memref<64x128xf32, #tpu.memory_space<vmem>>, vector<1x128xf32>,
    %c1_56 = arith.constant 1 : index
    %c7_57 = arith.constant 7 : index
    %62 = memref.load %arg1[%c1_56, %c7_57] : memref<2x8xi32, #tpu.memory_space<smem>>
    %63 = arith.index_cast %62 : i32 to index
    %c0_58 = arith.constant 0 : index
    %64 = vector.load %arg2[%63, %c0_58] : memref<32x128xf32, #tpu.memory_space<vmem>>, vector<1x128xf32>
    %c57 = arith.constant 57 : index
    %c0_59 = arith.constant 0 : index
    %65 = vector.load %arg7[%c57, %c0_59] : memref<64x128xf32, #tpu.memory_space<vmem>>, vector<1x128xf32>
    tpu.vector_store %arg7[%c57, %c0_59], %64 {strides = array<i32>} : memref<64x128xf32, #tpu.memory_space<vmem>>, vector<1x128xf32>,
    %c0_60 = arith.constant 0 : index
    %c0_61 = arith.constant 0 : index
    %66 = vector.load %arg3[%c0_60, %c0_61] : memref<128x128xbf16, #tpu.memory_space<vmem>>, vector<128x128xbf16>
    %cst_62 = arith.constant 0.000000e+00 : f32
    %67 = vector.broadcast %cst_62 : f32 to vector<8x128xf32>
    %c0_63 = arith.constant 0 : index
    %c0_64 = arith.constant 0 : index
    %68 = vector.load %arg7[%c0_63, %c0_64] : memref<64x128xf32, #tpu.memory_space<vmem>>, vector<8x128xf32>
    %69 = arith.truncf %67 : vector<8x128xf32> to vector<8x128xbf16>
    %cst_65 = arith.constant dense<0.000000e+00> : vector<8x128xf32>
    %70 = tpu.matmul %69, %66, %cst_65 {dimension_numbers = #tpu.dot_dimension_numbers<[1], [0], [0], [1], [0, 0, 1, 1], [], []>} : vector<8x128xbf16>, vector<128x128xbf16>, vector<8x128xf32> -> vector<8x128xf32>
    %71 = arith.addf %68, %70 : vector<8x128xf32>
    %72 = math.tanh %71 : vector<8x128xf32>
    %c8_66 = arith.constant 8 : index
    %c0_67 = arith.constant 0 : index
    %73 = vector.load %arg7[%c8_66, %c0_67] : memref<64x128xf32, #tpu.memory_space<vmem>>, vector<8x128xf32>
    %74 = arith.truncf %72 : vector<8x128xf32> to vector<8x128xbf16>
    %cst_68 = arith.constant dense<0.000000e+00> : vector<8x128xf32>
    %75 = tpu.matmul %74, %66, %cst_68 {dimension_numbers = #tpu.dot_dimension_numbers<[1], [0], [0], [1], [0, 0, 1, 1], [], []>} : vector<8x128xbf16>, vector<128x128xbf16>, vector<8x128xf32> -> vector<8x128xf32>
    %76 = arith.addf %73, %75 : vector<8x128xf32>
    %77 = math.tanh %76 : vector<8x128xf32>
    %c16_69 = arith.constant 16 : index
    %c0_70 = arith.constant 0 : index
    %78 = vector.load %arg7[%c16_69, %c0_70] : memref<64x128xf32, #tpu.memory_space<vmem>>, vector<8x128xf32>
    %79 = arith.truncf %77 : vector<8x128xf32> to vector<8x128xbf16>
    %cst_71 = arith.constant dense<0.000000e+00> : vector<8x128xf32>
    %80 = tpu.matmul %79, %66, %cst_71 {dimension_numbers = #tpu.dot_dimension_numbers<[1], [0], [0], [1], [0, 0, 1, 1], [], []>} : vector<8x128xbf16>, vector<128x128xbf16>, vector<8x128xf32> -> vector<8x128xf32>
    %81 = arith.addf %78, %80 : vector<8x128xf32>
    %82 = math.tanh %81 : vector<8x128xf32>
    %c24_72 = arith.constant 24 : index
    %c0_73 = arith.constant 0 : index
    %83 = vector.load %arg7[%c24_72, %c0_73] : memref<64x128xf32, #tpu.memory_space<vmem>>, vector<8x128xf32>
    %84 = arith.truncf %82 : vector<8x128xf32> to vector<8x128xbf16>
    %cst_74 = arith.constant dense<0.000000e+00> : vector<8x128xf32>
    %85 = tpu.matmul %84, %66, %cst_74 {dimension_numbers = #tpu.dot_dimension_numbers<[1], [0], [0], [1], [0, 0, 1, 1], [], []>} : vector<8x128xbf16>, vector<128x128xbf16>, vector<8x128xf32> -> vector<8x128xf32>
    %86 = arith.addf %83, %85 : vector<8x128xf32>
    %87 = math.tanh %86 : vector<8x128xf32>
    %c32_75 = arith.constant 32 : index
    %c0_76 = arith.constant 0 : index
    %88 = vector.load %arg7[%c32_75, %c0_76] : memref<64x128xf32, #tpu.memory_space<vmem>>, vector<8x128xf32>
    %89 = arith.truncf %87 : vector<8x128xf32> to vector<8x128xbf16>
    %cst_77 = arith.constant dense<0.000000e+00> : vector<8x128xf32>
    %90 = tpu.matmul %89, %66, %cst_77 {dimension_numbers = #tpu.dot_dimension_numbers<[1], [0], [0], [1], [0, 0, 1, 1], [], []>} : vector<8x128xbf16>, vector<128x128xbf16>, vector<8x128xf32> -> vector<8x128xf32>
    %91 = arith.addf %88, %90 : vector<8x128xf32>
    %92 = math.tanh %91 : vector<8x128xf32>
    %c40_78 = arith.constant 40 : index
    %c0_79 = arith.constant 0 : index
    %93 = vector.load %arg7[%c40_78, %c0_79] : memref<64x128xf32, #tpu.memory_space<vmem>>, vector<8x128xf32>
    %94 = arith.truncf %92 : vector<8x128xf32> to vector<8x128xbf16>
    %cst_80 = arith.constant dense<0.000000e+00> : vector<8x128xf32>
    %95 = tpu.matmul %94, %66, %cst_80 {dimension_numbers = #tpu.dot_dimension_numbers<[1], [0], [0], [1], [0, 0, 1, 1], [], []>} : vector<8x128xbf16>, vector<128x128xbf16>, vector<8x128xf32> -> vector<8x128xf32>
    %96 = arith.addf %93, %95 : vector<8x128xf32>
    %97 = math.tanh %96 : vector<8x128xf32>
    %c48_81 = arith.constant 48 : index
    %c0_82 = arith.constant 0 : index
    %98 = vector.load %arg7[%c48_81, %c0_82] : memref<64x128xf32, #tpu.memory_space<vmem>>, vector<8x128xf32>
    %99 = arith.truncf %97 : vector<8x128xf32> to vector<8x128xbf16>
    %cst_83 = arith.constant dense<0.000000e+00> : vector<8x128xf32>
    %100 = tpu.matmul %99, %66, %cst_83 {dimension_numbers = #tpu.dot_dimension_numbers<[1], [0], [0], [1], [0, 0, 1, 1], [], []>} : vector<8x128xbf16>, vector<128x128xbf16>, vector<8x128xf32> -> vector<8x128xf32>
    %101 = arith.addf %98, %100 : vector<8x128xf32>
    %102 = math.tanh %101 : vector<8x128xf32>
    %c56_84 = arith.constant 56 : index
    %c0_85 = arith.constant 0 : index
    %103 = vector.load %arg7[%c56_84, %c0_85] : memref<64x128xf32, #tpu.memory_space<vmem>>, vector<8x128xf32>
    %104 = arith.truncf %102 : vector<8x128xf32> to vector<8x128xbf16>
    %cst_86 = arith.constant dense<0.000000e+00> : vector<8x128xf32>
    %105 = tpu.matmul %104, %66, %cst_86 {dimension_numbers = #tpu.dot_dimension_numbers<[1], [0], [0], [1], [0, 0, 1, 1], [], []>} : vector<8x128xbf16>, vector<128x128xbf16>, vector<8x128xf32> -> vector<8x128xf32>
    %106 = arith.addf %103, %105 : vector<8x128xf32>
    %107 = math.tanh %106 : vector<8x128xf32>
    %108 = arith.truncf %107 : vector<8x128xf32> to vector<8x128xbf16>
    %c0_87 = arith.constant 0 : index
    %c0_88 = arith.constant 0 : index
    %109 = vector.load %arg4[%c0_87, %c0_88] : memref<128x128xbf16, #tpu.memory_space<vmem>>, vector<128x128xbf16>
    %cst_89 = arith.constant dense<0.000000e+00> : vector<8x128xf32>
    %110 = tpu.matmul %108, %109, %cst_89 {dimension_numbers = #tpu.dot_dimension_numbers<[1], [0], [0], [1], [0, 0, 1, 1], [], []>} : vector<8x128xbf16>, vector<128x128xbf16>, vector<8x128xf32> -> vector<8x128xf32>
    %c0_90 = arith.constant 0 : index
    %c0_91 = arith.constant 0 : index
    %111 = vector.load %arg5[%c0_90, %c0_91] : memref<1x128xf32, #tpu.memory_space<vmem>>, vector<1x128xf32>
    %112 = vector.broadcast %111 : vector<1x128xf32> to vector<8x128xf32>
    %113 = arith.addf %110, %112 : vector<8x128xf32>
    %c0_92 = arith.constant 0 : index
    %c0_93 = arith.constant 0 : index
    %114 = vector.load %arg6[%c0_92, %c0_93] : memref<8x128xf32, #tpu.memory_space<vmem>>, vector<8x128xf32>
    tpu.vector_store %arg6[%c0_92, %c0_93], %113 {strides = array<i32>} : memref<8x128xf32, #tpu.memory_space<vmem>>, vector<8x128xf32>,
    return
  }
  func.func @transform_0(%arg0: i32, %arg1: memref<2x8xi32, #tpu.memory_space<smem>>) -> (i32, i32) {
    %c0_i32 = arith.constant 0 : i32
    %c0_i32_0 = arith.constant 0 : i32
    %c0_i32_1 = arith.constant 0 : i32
    return %c0_i32, %c0_i32_0 : i32, i32
  }
  func.func @transform_1(%arg0: i32, %arg1: memref<2x8xi32, #tpu.memory_space<smem>>) -> (i32, i32) {
    %c0_i32 = arith.constant 0 : i32
    %c0_i32_0 = arith.constant 0 : i32
    %c0_i32_1 = arith.constant 0 : i32
    return %c0_i32, %c0_i32_0 : i32, i32
  }
  func.func @transform_2(%arg0: i32, %arg1: memref<2x8xi32, #tpu.memory_space<smem>>) -> (i32, i32) {
    %c0_i32 = arith.constant 0 : i32
    %c0_i32_0 = arith.constant 0 : i32
    %c0_i32_1 = arith.constant 0 : i32
    return %c0_i32, %c0_i32_0 : i32, i32
  }
  func.func @transform_3(%arg0: i32, %arg1: memref<2x8xi32, #tpu.memory_space<smem>>) -> (i32, i32) {
    %c0_i32 = arith.constant 0 : i32
    %c0_i32_0 = arith.constant 0 : i32
    %c0_i32_1 = arith.constant 0 : i32
    return %c0_i32, %c0_i32_0 : i32, i32
  }
  func.func @transform_4(%arg0: i32, %arg1: memref<2x8xi32, #tpu.memory_space<smem>>) -> (i32, i32) {
    %c0_i32 = arith.constant 0 : i32
    %c0_i32_0 = arith.constant 0 : i32
    %c0_i32_1 = arith.constant 0 : i32
    return %c0_i32, %c0_i32_0 : i32, i32
  }
}

</mosaic_0001>

<bundles_post_ra>
// kernel: nlp_multi_classification_forward.1
= control target key start
LH: loop header
LB: loop body
LE: loop exit
PB: predicated region body
PF: predicated region fallthrough
CT: control target
= control target key end

     0   :  { %s1096_s18 = smov [#allocation4]   ;;  %s1333_s0 = inlined_call_operand.hbm [shape: s32[2,8], index: 0, kind: input, shape index: {}]   ;;  %s1334_s1 = inlined_call_operand.hbm [shape: f32[32,128], index: 1, kind: input, shape index: {}]   ;;  %s1335_s2 = inlined_call_operand.hbm [shape: bf16[128,128], index: 2, kind: input, shape index: {}]   ;;  %s1336_s3 = inlined_call_operand.hbm [shape: bf16[128,128], index: 3, kind: input, shape index: {}]   ;;  %s1337_s4 = inlined_call_operand.vmem [shape: f32[1,128], index: 4, kind: input, shape index: {}]   ;;  %s1338_s5 = inlined_call_operand.vmem [shape: f32[8,128], index: 5, kind: output, shape index: {}]  }
   0x1   :  { %11 = dma.hbm_to_smem %s1333_s0, 32, %s1096_s18, [#allocation3] }
   0x2   :  { %1090 = dma.done.wait [#allocation3], 32 }
   0x3   :  { %1091 = vsyncadd [#allocation3], 4294967264 }
   0x4   :  { %13 = sfence }
   0x5   :  { %14 = vsyncpa [#allocation6], 0 }
   0x6   :  { %15 = vsyncpa [#allocation8], 0  ;;  %s1097_s21 = smov [#allocation7]  }
   0x7   :  { %s33_s22 = sshll.u32 %s1097_s21, 4  ;;  %s34_s22 = int_to_ptr.vmem [resolvable:$true] %s33_s22 }
   0x8   :  { %s1038_s23 = scalar_lea.vmem %s34_s22, 1024  ;;  %p1043_p1 = scmp.lt.s32.totalorder %s34_s22, %s34_s22 }
   0x9   :  { %p1039_p0 = scmp.ne.s32.totalorder %s34_s22, %s1038_s23  ;;  %p1044_p2 = scmp.lt.s32.totalorder %s1038_s23, %s1038_s23 }
   0xb   :  { %p1045_p3 = por %p1044_p2, %p1043_p1 }
   0xd   :  { %p1046_p4 = pnand %p1045_p3, %p1039_p0 }
   0xf   :  { %1049 = shalt.err (!%p1046_p4)
}
  0x10   :  { %s1098_s24 = smov 64   ;;  %s1099_s25 = smov 4  }
  0x11   :  { %39 = dma.hbm_to_vmem [thread:$0]  %s1335_s2, 1024, %s34_s22, [#allocation8], %s1098_s24, %s1098_s24, %s1099_s25  }
  0x12   :  { %s1100_s0 = smov [#allocation5]  }
  0x13   :  { %s21_s28 = sshll.u32 %s1100_s0, 4  ;;  %s22_s28 = int_to_ptr.vmem [resolvable:$true] %s21_s28 }
  0x14   :  { %s1058_s29 = scalar_lea.vmem %s22_s28, 512  ;;  %p1063_p6 = scmp.lt.s32.totalorder %s22_s28, %s22_s28 }
  0x15   :  { %p1059_p5 = scmp.ne.s32.totalorder %s22_s28, %s1058_s29  ;;  %p1064_p7 = scmp.lt.s32.totalorder %s1058_s29, %s1058_s29 }
  0x17   :  { %p1065_p8 = por %p1064_p7, %p1063_p6 }
  0x19   :  { %p1066_p9 = pnand %p1065_p8, %p1059_p5 }
  0x1b   :  { %1069 = shalt.err (!%p1066_p9)
}
  0x1c   :  { %s1101_s30 = smov 128   ;;  %s1102_s6 = smov 8  }
  0x1d   :  { %27 = dma.hbm_to_vmem [thread:$0]  %s1334_s1, 512, %s22_s28, [#allocation6], %s1101_s30, %s1101_s30, %s1102_s6  }
  0x1e   :  { %s1103_s9 = smov [#allocation9]  }
  0x1f   :  { %s45_s10 = sshll.u32 %s1103_s9, 4  ;;  %s46_s10 = int_to_ptr.vmem [resolvable:$true] %s45_s10 }
  0x20   :  { %s1078_s2 = scalar_lea.vmem %s46_s10, 1024  ;;  %p1083_p11 = scmp.lt.s32.totalorder %s46_s10, %s46_s10 }
  0x21   :  { %p1079_p10 = scmp.ne.s32.totalorder %s46_s10, %s1078_s2  ;;  %p1084_p12 = scmp.lt.s32.totalorder %s1078_s2, %s1078_s2 }
  0x23   :  { %p1085_p13 = por %p1084_p12, %p1083_p11 }
  0x25   :  { %p1086_p0 = pnand %p1085_p13, %p1079_p10 }
  0x27   :  { %1089 = shalt.err (!%p1086_p0)
}
  0x28   :  { %51 = dma.hbm_to_vmem [thread:$0]  %s1336_s3, 1024, %s46_s10, [#allocation8], %s1098_s24, %s1098_s24, %s1099_s25  }
  0x29   :  { %1092 = dma.done.wait [#allocation6], 512  }
  0x2a   :  { %1093 = vsyncadd [#allocation6], 4294966784 }
  0x2b   :  { %1094 = dma.done.wait [#allocation8], 2048  }
  0x2c   :  { %1095 = vsyncadd [#allocation8], 4294965248  ;;  %v1104_v0 = vmov 0.0   ;;  %vm1105_vm0 = vmmov 0   ;;  %s72_s1 = sld [smem:[#allocation4]]  ;;  %v1163_v1 = vld [vmem:[#allocation7 + $0x38] sm:$0xff]  }
  0x2d   :  { %799 = vmatprep.subr.bf16.mxu0 %v1104_v0  ;;  %64 = vst [vmem:[#allocation2] sm:$0xff] %v1104_v0  ;;  %65 = vst [vmem:[#allocation2 + $0x8] sm:$0xff] %v1104_v0  ;;  %815 = vmatprep.mubr.msk.bf16.mxu0 %vm1105_vm0, %v1104_v0  ;;  %s686_s3 = sld [smem:[#allocation4 + $0x80]]  ;;  %v1166_v2 = vld [vmem:[#allocation7 + $0x30] sm:$0xff]   ;;  %v1172_v3 = vld [vmem:[#allocation7 + $0x28] sm:$0xff]   ;;  %v1106_v11 = vmov 0  }
  0x2e   :  { %66 = vst [vmem:[#allocation2 + $0x10] sm:$0xff] %v1104_v0  ;;  %67 = vst [vmem:[#allocation2 + $0x18] sm:$0xff] %v1104_v0  ;;  %819 = vmatprep.subr.bf16.mxu1 %v1104_v0  ;;  %835 = vmatprep.mubr.msk.bf16.mxu1 %vm1105_vm0, %v1104_v0  ;;  %v1177_v4 = vld [vmem:[#allocation7 + $0x20] sm:$0xff]   ;;  %v1184_v7 = vld [vmem:[#allocation7 + $0x18] sm:$0xff]   ;;  %s687_s15 = sld [smem:[#allocation4 + $0x1]] }
  0x2f   :  { %68 = vst [vmem:[#allocation2 + $0x20] sm:$0xff] %v1104_v0  ;;  %69 = vst [vmem:[#allocation2 + $0x28] sm:$0xff] %v1104_v0  ;;  %800 = vmatpush3.bf16.msra.mxu0 %v1163_v1  ;;  %820 = vmatpush3.bf16.msra.mxu1 %v1163_v1  ;;  %v1190_v8 = vld [vmem:[#allocation7 + $0x10] sm:$0xff]   ;;  %v1196_v9 = vld [vmem:[#allocation7 + $0x8] sm:$0xff]   ;;  %s688_s16 = sld [smem:[#allocation4 + $0x81]] }
  0x30   :  { %70 = vst [vmem:[#allocation2 + $0x30] sm:$0xff] %v1104_v0  ;;  %71 = vst [vmem:[#allocation2 + $0x38] sm:$0xff] %v1104_v0  ;;  %801 = vmatprep.subr.bf16.mxu0 %v1104_v0  ;;  %821 = vmatprep.subr.bf16.mxu1 %v1104_v0  ;;  %v1202_v10 = vld [vmem:[#allocation7] sm:$0xff]   ;;  %s689_s19 = sld [smem:[#allocation4 + $0x2]] }
  0x31   :  { %s690_s20 = sld [smem:[#allocation4 + $0x82]] }
  0x32   :  { %s73_s13 = scalar_lea.vmem [#allocation5], %s72_s1  ;;  %s691_s23 = sld [smem:[#allocation4 + $0x3]] }
  0x33   :  { %802 = vmatpush3.bf16.msra.mxu0 %v1166_v2  ;;  %822 = vmatpush3.bf16.msra.mxu1 %v1166_v2  ;;  %v74_v5 = vld [vmem:[%s73_s13] sm:$0x1]  ;;  %s77_s14 = scalar_lea.vmem [#allocation5], %s686_s3  ;;  %s692_s24 = sld [smem:[#allocation4 + $0x83]] }
  0x34   :  { %803 = vmatprep.subr.bf16.mxu0 %v1104_v0  ;;  %823 = vmatprep.subr.bf16.mxu1 %v1104_v0  ;;  %v78_v6 = vld [vmem:[%s77_s14] sm:$0x1]  ;;  %75 = vst [vmem:[#allocation2] sm:$0x1] %v74_v5  ;;  %s81_s17 = scalar_lea.vmem [#allocation5], %s687_s15  ;;  %s693_s27 = sld [smem:[#allocation4 + $0x4]] }
  0x35   :  { %79 = vst [vmem:[#allocation2 + $0x1] sm:$0x1] %v78_v6  ;;  %v82_v12 = vld [vmem:[%s81_s17] sm:$0x1]  ;;  %s85_s18 = scalar_lea.vmem [#allocation5], %s688_s16  ;;  %s694_s0 = sld [smem:[#allocation4 + $0x84]] }
  0x36   :  { %83 = vst [vmem:[#allocation2 + $0x8] sm:$0x1] %v82_v12  ;;  %v86_v13 = vld [vmem:[%s85_s18] sm:$0x1]  ;;  %s89_s21 = scalar_lea.vmem [#allocation5], %s689_s19  ;;  %s695_s30 = sld [smem:[#allocation4 + $0x5]] }
  0x37   :  { %804 = vmatpush3.bf16.msra.mxu0 %v1172_v3  ;;  %824 = vmatpush3.bf16.msra.mxu1 %v1172_v3  ;;  %87 = vst [vmem:[#allocation2 + $0x9] sm:$0x1] %v86_v13  ;;  %v90_v22 = vld [vmem:[%s89_s21] sm:$0x1]  ;;  %s93_s22 = scalar_lea.vmem [#allocation5], %s690_s20  ;;  %s696_s6 = sld [smem:[#allocation4 + $0x85]] }
  0x38   :  { %805 = vmatprep.subr.bf16.mxu0 %v1104_v0  ;;  %825 = vmatprep.subr.bf16.mxu1 %v1104_v0  ;;  %91 = vst [vmem:[#allocation2 + $0x10] sm:$0x1] %v90_v22  ;;  %v94_v23 = vld [vmem:[%s93_s22] sm:$0x1]  ;;  %s97_s25 = scalar_lea.vmem [#allocation5], %s691_s23  ;;  %s697_s9 = sld [smem:[#allocation4 + $0x6]] }
  0x39   :  { %95 = vst [vmem:[#allocation2 + $0x11] sm:$0x1] %v94_v23  ;;  %v98_v32 = vld [vmem:[%s97_s25] sm:$0x1]  ;;  %s101_s26 = scalar_lea.vmem [#allocation5], %s692_s24  ;;  %s698_s10 = sld [smem:[#allocation4 + $0x86]] }
  0x3a   :  { %99 = vst [vmem:[#allocation2 + $0x18] sm:$0x1] %v98_v32  ;;  %v102_v33 = vld [vmem:[%s101_s26] sm:$0x1]  ;;  %s105_s28 = scalar_lea.vmem [#allocation5], %s693_s27  ;;  %s699_s12 = sld [smem:[#allocation4 + $0x7]] }
  0x3b   :  { %806 = vmatpush3.bf16.msra.mxu0 %v1177_v4  ;;  %826 = vmatpush3.bf16.msra.mxu1 %v1177_v4  ;;  %103 = vst [vmem:[#allocation2 + $0x19] sm:$0x1] %v102_v33  ;;  %v106_v42 = vld [vmem:[%s105_s28] sm:$0x1]  ;;  %s109_s29 = scalar_lea.vmem [#allocation5], %s694_s0  ;;  %s700_s1 = sld [smem:[#allocation4 + $0x87]] }
  0x3c   :  { %807 = vmatprep.subr.bf16.mxu0 %v1104_v0  ;;  %827 = vmatprep.subr.bf16.mxu1 %v1104_v0  ;;  %v152_v14 = vld [vmem:[#allocation2] sm:$0xff]  ;;  %107 = vst [vmem:[#allocation2 + $0x20] sm:$0x1] %v106_v42  ;;  %s113_s7 = scalar_lea.vmem [#allocation5], %s695_s30  ;;  %v1002_v23 = vld [vmem:[#allocation9 + $0x18] sm:$0xff]  }
  0x3d   :  { %v110_v43 = vld [vmem:[%s109_s29] sm:$0x1]  ;;  %s117_s8 = scalar_lea.vmem [#allocation5], %s696_s6 }
  0x3e   :  { %v243_v24 = vld [vmem:[#allocation2 + $0x8] sm:$0xff]  ;;  %111 = vst [vmem:[#allocation2 + $0x21] sm:$0x1] %v110_v43  ;;  %v114_v52 = vld [vmem:[%s113_s7] sm:$0x1]  ;;  %s121_s2 = scalar_lea.vmem [#allocation5], %s697_s9 }
  0x3f   :  { %808 = vmatpush3.bf16.msra.mxu0 %v1184_v7  ;;  %828 = vmatpush3.bf16.msra.mxu1 %v1184_v7  ;;  %115 = vst [vmem:[#allocation2 + $0x28] sm:$0x1] %v114_v52  ;;  %v118_v53 = vld [vmem:[%s117_s8] sm:$0x1]  ;;  %s125_s11 = scalar_lea.vmem [#allocation5], %s698_s10 }
  0x40   :  { %809 = vmatprep.subr.bf16.mxu0 %v1104_v0  ;;  %829 = vmatprep.subr.bf16.mxu1 %v1104_v0  ;;  %v287_v34 = vld [vmem:[#allocation2 + $0x10] sm:$0xff]  ;;  %119 = vst [vmem:[#allocation2 + $0x29] sm:$0x1] %v118_v53  ;;  %v122_v62 = vld [vmem:[%s121_s2] sm:$0x1]  ;;  %s129_s3 = scalar_lea.vmem [#allocation5], %s699_s12 }
  0x41   :  { %123 = vst [vmem:[#allocation2 + $0x30] sm:$0x1] %v122_v62  ;;  %v126_v63 = vld [vmem:[%s125_s11] sm:$0x1]  ;;  %s133_s13 = scalar_lea.vmem [#allocation5], %s700_s1 }
  0x42   :  { %v331_v44 = vld [vmem:[#allocation2 + $0x18] sm:$0xff]  ;;  %127 = vst [vmem:[#allocation2 + $0x31] sm:$0x1] %v126_v63  ;;  %v130_v12 = vld [vmem:[%s129_s3] sm:$0x1] }
  0x43   :  { %810 = vmatpush3.bf16.msra.mxu0 %v1190_v8  ;;  %830 = vmatpush3.bf16.msra.mxu1 %v1190_v8  ;;  %131 = vst [vmem:[#allocation2 + $0x38] sm:$0x1] %v130_v12  ;;  %v134_v13 = vld [vmem:[%s133_s13] sm:$0x1] }
  0x44   :  { %811 = vmatprep.subr.bf16.mxu0 %v1104_v0  ;;  %831 = vmatprep.subr.bf16.mxu1 %v1104_v0  ;;  %135 = vst [vmem:[#allocation2 + $0x39] sm:$0x1] %v134_v13  ;;  %v1001_v22 = vld [vmem:[#allocation9 + $0x20] sm:$0xff]  }
  0x45   :  { %v375_v54 = vld [vmem:[#allocation2 + $0x20] sm:$0xff] }
  0x47   :  { %812 = vmatpush3.bf16.msra.mxu0 %v1196_v9  ;;  %832 = vmatpush3.bf16.msra.mxu1 %v1196_v9 }
  0x48   :  { %813 = vmatprep.subr.bf16.mxu0 %v1104_v0  ;;  %833 = vmatprep.subr.bf16.mxu1 %v1104_v0 }
  0x4b   :  { %814 = vmatpush3.bf16.msra.mxu0 %v1202_v10  ;;  %834 = vmatpush3.bf16.msra.mxu1 %v1202_v10 }
  0x4c   :  { %839 = vmatprep.subr.bf16.mxu0 %v1104_v0  ;;  %859 = vmatprep.subr.bf16.mxu1 %v1104_v0 }
  0x4e   :  { %816 = vmatmul.mubr.bf16.vlgmr.msra.gmra.mxu0 %v1106_v11  ;;  %v1000_v11 = vld [vmem:[#allocation9 + $0x28] sm:$0xff]  }
  0x4f   :  { %840 = vmatpush3.bf16.msra.mxu0 %v1163_v1  ;;  %855 = vmatprep.mubr.msk.bf16.mxu0 %vm1105_vm0, %v1104_v0 }
  0x50   :  { %841 = vmatprep.subr.bf16.mxu0 %v1104_v0 }
  0x53   :  { %842 = vmatpush3.bf16.msra.mxu0 %v1166_v2 }
  0x54   :  { %843 = vmatprep.subr.bf16.mxu0 %v1104_v0 }
  0x57   :  { %844 = vmatpush3.bf16.msra.mxu0 %v1172_v3 }
  0x58   :  { %845 = vmatprep.subr.bf16.mxu0 %v1104_v0 }
  0x5b   :  { %846 = vmatpush3.bf16.msra.mxu0 %v1177_v4 }
  0x5c   :  { %847 = vmatprep.subr.bf16.mxu0 %v1104_v0 }
  0x5f   :  { %848 = vmatpush3.bf16.msra.mxu0 %v1184_v7 }
  0x60   :  { %849 = vmatprep.subr.bf16.mxu0 %v1104_v0 }
  0x63   :  { %850 = vmatpush3.bf16.msra.mxu0 %v1190_v8 }
  0x64   :  { %851 = vmatprep.subr.bf16.mxu0 %v1104_v0 }
  0x67   :  { %852 = vmatpush3.bf16.msra.mxu0 %v1196_v9 }
  0x68   :  { %853 = vmatprep.subr.bf16.mxu0 %v1104_v0 }
  0x6b   :  { %854 = vmatpush3.bf16.msra.mxu0 %v1202_v10 }
  0x6c   :  { %879 = vmatprep.subr.bf16.mxu0 %v1104_v0 }
 0x10e   :  { %v235_v15 = vpop.f32.mrf.mxu0 }
 0x10f   :  { %v241_v16 = vadd.f32 %v235_v15, %v152_v14  ;;  %v463_v14 = vld [vmem:[#allocation2 + $0x30] sm:$0xff] }
 0x110   :  { %v817_v17 = vpop.f32.mrf.mxu0 }
 0x111   :  { %1006 = vtanh.f32 %v241_v16 }
 0x112   :  { %v238_v18 = vpop.f32.mrf.mxu0 }
 0x114   :  { %v818_v19 = vpop.f32.mrf.mxu0 }
 0x11e   :  { %v1007_v20 = vpop.eup %1006 }
 0x11f   :  { %v244_v21 = vpack.c.bf16 %v1007_v20, %v1007_v20 }
 0x121   :  { %836 = vmatmul.mubr.bf16.vlgmr.msra.gmra.mxu1 %v244_v21 }
 0x122   :  { %860 = vmatpush3.bf16.msra.mxu1 %v1163_v1  ;;  %875 = vmatprep.mubr.msk.bf16.mxu1 %vm1105_vm0, %v1104_v0 }
 0x123   :  { %861 = vmatprep.subr.bf16.mxu1 %v1104_v0 }
 0x126   :  { %862 = vmatpush3.bf16.msra.mxu1 %v1166_v2 }
 0x127   :  { %863 = vmatprep.subr.bf16.mxu1 %v1104_v0 }
 0x12a   :  { %864 = vmatpush3.bf16.msra.mxu1 %v1172_v3 }
 0x12b   :  { %865 = vmatprep.subr.bf16.mxu1 %v1104_v0 }
 0x12e   :  { %866 = vmatpush3.bf16.msra.mxu1 %v1177_v4 }
 0x12f   :  { %867 = vmatprep.subr.bf16.mxu1 %v1104_v0 }
 0x132   :  { %868 = vmatpush3.bf16.msra.mxu1 %v1184_v7 }
 0x133   :  { %869 = vmatprep.subr.bf16.mxu1 %v1104_v0 }
 0x136   :  { %870 = vmatpush3.bf16.msra.mxu1 %v1190_v8 }
 0x137   :  { %871 = vmatprep.subr.bf16.mxu1 %v1104_v0 }
 0x13a   :  { %872 = vmatpush3.bf16.msra.mxu1 %v1196_v9 }
 0x13b   :  { %873 = vmatprep.subr.bf16.mxu1 %v1104_v0 }
 0x13e   :  { %874 = vmatpush3.bf16.msra.mxu1 %v1202_v10 }
 0x13f   :  { %899 = vmatprep.subr.bf16.mxu1 %v1104_v0 }
 0x1e1   :  { %v279_v25 = vpop.f32.mrf.mxu1 }
 0x1e2   :  { %v285_v26 = vadd.f32 %v279_v25, %v243_v24  ;;  %v1003_v24 = vld [vmem:[#allocation9 + $0x10] sm:$0xff]   ;;  %v1004_v25 = vld [vmem:[#allocation9 + $0x8] sm:$0xff]  }
 0x1e3   :  { %v837_v27 = vpop.f32.mrf.mxu1 }
 0x1e4   :  { %1008 = vtanh.f32 %v285_v26  ;;  %v1005_v26 = vld [vmem:[#allocation9] sm:$0xff]   ;;  %v507_v27 = vld [vmem:[#allocation2 + $0x38] sm:$0xff] }
 0x1e5   :  { %v282_v28 = vpop.f32.mrf.mxu1 }
 0x1e7   :  { %v838_v29 = vpop.f32.mrf.mxu1 }
 0x1f1   :  { %v1009_v30 = vpop.eup %1008 }
 0x1f2   :  { %v288_v31 = vpack.c.bf16 %v1009_v30, %v1009_v30 }
 0x1f4   :  { %856 = vmatmul.mubr.bf16.vlgmr.msra.gmra.mxu0 %v288_v31 }
 0x1f5   :  { %880 = vmatpush3.bf16.msra.mxu0 %v1163_v1  ;;  %895 = vmatprep.mubr.msk.bf16.mxu0 %vm1105_vm0, %v1104_v0 }
 0x1f6   :  { %881 = vmatprep.subr.bf16.mxu0 %v1104_v0 }
 0x1f9   :  { %882 = vmatpush3.bf16.msra.mxu0 %v1166_v2 }
 0x1fa   :  { %883 = vmatprep.subr.bf16.mxu0 %v1104_v0 }
 0x1fd   :  { %884 = vmatpush3.bf16.msra.mxu0 %v1172_v3 }
 0x1fe   :  { %885 = vmatprep.subr.bf16.mxu0 %v1104_v0 }
 0x201   :  { %886 = vmatpush3.bf16.msra.mxu0 %v1177_v4 }
 0x202   :  { %887 = vmatprep.subr.bf16.mxu0 %v1104_v0 }
 0x205   :  { %888 = vmatpush3.bf16.msra.mxu0 %v1184_v7 }
 0x206   :  { %889 = vmatprep.subr.bf16.mxu0 %v1104_v0 }
 0x209   :  { %890 = vmatpush3.bf16.msra.mxu0 %v1190_v8 }
 0x20a   :  { %891 = vmatprep.subr.bf16.mxu0 %v1104_v0 }
 0x20d   :  { %892 = vmatpush3.bf16.msra.mxu0 %v1196_v9 }
 0x20e   :  { %893 = vmatprep.subr.bf16.mxu0 %v1104_v0 }
 0x211   :  { %894 = vmatpush3.bf16.msra.mxu0 %v1202_v10 }
 0x212   :  { %919 = vmatprep.subr.bf16.mxu0 %v1104_v0 }
 0x2b4   :  { %v323_v35 = vpop.f32.mrf.mxu0 }
 0x2b5   :  { %v329_v36 = vadd.f32 %v323_v35, %v287_v34  ;;  %v709_v35 = vld [vmem:[%s1337_s4] ss:$0 sm:$0xff] }
 0x2b6   :  { %v857_v37 = vpop.f32.mrf.mxu0 }
 0x2b7   :  { %1010 = vtanh.f32 %v329_v36 }
 0x2b8   :  { %v326_v38 = vpop.f32.mrf.mxu0 }
 0x2ba   :  { %v858_v39 = vpop.f32.mrf.mxu0 }
 0x2c4   :  { %v1011_v40 = vpop.eup %1010 }
 0x2c5   :  { %v332_v41 = vpack.c.bf16 %v1011_v40, %v1011_v40 }
 0x2c7   :  { %876 = vmatmul.mubr.bf16.vlgmr.msra.gmra.mxu1 %v332_v41 }
 0x2c8   :  { %900 = vmatpush3.bf16.msra.mxu1 %v1163_v1  ;;  %915 = vmatprep.mubr.msk.bf16.mxu1 %vm1105_vm0, %v1104_v0 }
 0x2c9   :  { %901 = vmatprep.subr.bf16.mxu1 %v1104_v0 }
 0x2cc   :  { %902 = vmatpush3.bf16.msra.mxu1 %v1166_v2 }
 0x2cd   :  { %903 = vmatprep.subr.bf16.mxu1 %v1104_v0 }
 0x2d0   :  { %904 = vmatpush3.bf16.msra.mxu1 %v1172_v3 }
 0x2d1   :  { %905 = vmatprep.subr.bf16.mxu1 %v1104_v0 }
 0x2d4   :  { %906 = vmatpush3.bf16.msra.mxu1 %v1177_v4 }
 0x2d5   :  { %907 = vmatprep.subr.bf16.mxu1 %v1104_v0 }
 0x2d8   :  { %908 = vmatpush3.bf16.msra.mxu1 %v1184_v7 }
 0x2d9   :  { %909 = vmatprep.subr.bf16.mxu1 %v1104_v0 }
 0x2dc   :  { %910 = vmatpush3.bf16.msra.mxu1 %v1190_v8 }
 0x2dd   :  { %911 = vmatprep.subr.bf16.mxu1 %v1104_v0 }
 0x2e0   :  { %912 = vmatpush3.bf16.msra.mxu1 %v1196_v9 }
 0x2e1   :  { %913 = vmatprep.subr.bf16.mxu1 %v1104_v0 }
 0x2e4   :  { %914 = vmatpush3.bf16.msra.mxu1 %v1202_v10 }
 0x2e5   :  { %939 = vmatprep.subr.bf16.mxu1 %v1104_v0 }
 0x387   :  { %v367_v45 = vpop.f32.mrf.mxu1 }
 0x388   :  { %v373_v46 = vadd.f32 %v367_v45, %v331_v44 }
 0x389   :  { %v877_v47 = vpop.f32.mrf.mxu1 }
 0x38a   :  { %1012 = vtanh.f32 %v373_v46 }
 0x38b   :  { %v370_v48 = vpop.f32.mrf.mxu1 }
 0x38d   :  { %v878_v49 = vpop.f32.mrf.mxu1 }
 0x397   :  { %v1013_v50 = vpop.eup %1012 }
 0x398   :  { %v376_v51 = vpack.c.bf16 %v1013_v50, %v1013_v50 }
 0x39a   :  { %896 = vmatmul.mubr.bf16.vlgmr.msra.gmra.mxu0 %v376_v51 }
 0x39b   :  { %920 = vmatpush3.bf16.msra.mxu0 %v1163_v1  ;;  %935 = vmatprep.mubr.msk.bf16.mxu0 %vm1105_vm0, %v1104_v0 }
 0x39c   :  { %921 = vmatprep.subr.bf16.mxu0 %v1104_v0 }
 0x39f   :  { %922 = vmatpush3.bf16.msra.mxu0 %v1166_v2 }
 0x3a0   :  { %923 = vmatprep.subr.bf16.mxu0 %v1104_v0 }
 0x3a3   :  { %924 = vmatpush3.bf16.msra.mxu0 %v1172_v3 }
 0x3a4   :  { %925 = vmatprep.subr.bf16.mxu0 %v1104_v0 }
 0x3a7   :  { %926 = vmatpush3.bf16.msra.mxu0 %v1177_v4 }
 0x3a8   :  { %927 = vmatprep.subr.bf16.mxu0 %v1104_v0 }
 0x3ab   :  { %928 = vmatpush3.bf16.msra.mxu0 %v1184_v7 }
 0x3ac   :  { %929 = vmatprep.subr.bf16.mxu0 %v1104_v0 }
 0x3af   :  { %930 = vmatpush3.bf16.msra.mxu0 %v1190_v8 }
 0x3b0   :  { %931 = vmatprep.subr.bf16.mxu0 %v1104_v0 }
 0x3b3   :  { %932 = vmatpush3.bf16.msra.mxu0 %v1196_v9 }
 0x3b4   :  { %933 = vmatprep.subr.bf16.mxu0 %v1104_v0 }
 0x3b7   :  { %934 = vmatpush3.bf16.msra.mxu0 %v1202_v10 }
 0x3b8   :  { %959 = vmatprep.subr.bf16.mxu0 %v1104_v0 }
 0x45a   :  { %v411_v55 = vpop.f32.mrf.mxu0 }
 0x45b   :  { %v417_v56 = vadd.f32 %v411_v55, %v375_v54 }
 0x45c   :  { %v897_v57 = vpop.f32.mrf.mxu0 }
 0x45d   :  { %1014 = vtanh.f32 %v417_v56 }
 0x45e   :  { %v414_v58 = vpop.f32.mrf.mxu0 }
 0x460   :  { %v898_v59 = vpop.f32.mrf.mxu0 }
 0x46a   :  { %v1015_v60 = vpop.eup %1014 }
 0x46b   :  { %v420_v61 = vpack.c.bf16 %v1015_v60, %v1015_v60 }
 0x46d   :  { %916 = vmatmul.mubr.bf16.vlgmr.msra.gmra.mxu1 %v420_v61 }
 0x46e   :  { %940 = vmatpush3.bf16.msra.mxu1 %v1163_v1  ;;  %955 = vmatprep.mubr.msk.bf16.mxu1 %vm1105_vm0, %v1104_v0  ;;  %v419_v1 = vld [vmem:[#allocation2 + $0x28] sm:$0xff] }
 0x46f   :  { %941 = vmatprep.subr.bf16.mxu1 %v1104_v0 }
 0x472   :  { %942 = vmatpush3.bf16.msra.mxu1 %v1166_v2 }
 0x473   :  { %943 = vmatprep.subr.bf16.mxu1 %v1104_v0 }
 0x476   :  { %944 = vmatpush3.bf16.msra.mxu1 %v1172_v3 }
 0x477   :  { %945 = vmatprep.subr.bf16.mxu1 %v1104_v0 }
 0x47a   :  { %946 = vmatpush3.bf16.msra.mxu1 %v1177_v4 }
 0x47b   :  { %947 = vmatprep.subr.bf16.mxu1 %v1104_v0 }
 0x47e   :  { %948 = vmatpush3.bf16.msra.mxu1 %v1184_v7 }
 0x47f   :  { %949 = vmatprep.subr.bf16.mxu1 %v1104_v0 }
 0x482   :  { %950 = vmatpush3.bf16.msra.mxu1 %v1190_v8 }
 0x483   :  { %951 = vmatprep.subr.bf16.mxu1 %v1104_v0 }
 0x486   :  { %952 = vmatpush3.bf16.msra.mxu1 %v1196_v9  ;;  %v998_v9 = vld [vmem:[#allocation9 + $0x38] sm:$0xff]  }
 0x487   :  { %953 = vmatprep.subr.bf16.mxu1 %v1104_v0 }
 0x48a   :  { %954 = vmatpush3.bf16.msra.mxu1 %v1202_v10  ;;  %v999_v10 = vld [vmem:[#allocation9 + $0x30] sm:$0xff]  }
 0x52d   :  { %v455_v2 = vpop.f32.mrf.mxu1 }
 0x52e   :  { %v461_v3 = vadd.f32 %v455_v2, %v419_v1 }
 0x52f   :  { %v917_v4 = vpop.f32.mrf.mxu1 }
 0x530   :  { %1016 = vtanh.f32 %v461_v3 }
 0x531   :  { %v458_v5 = vpop.f32.mrf.mxu1 }
 0x533   :  { %v918_v6 = vpop.f32.mrf.mxu1 }
 0x53d   :  { %v1017_v7 = vpop.eup %1016 }
 0x53e   :  { %v464_v8 = vpack.c.bf16 %v1017_v7, %v1017_v7 }
 0x540   :  { %936 = vmatmul.mubr.bf16.vlgmr.msra.gmra.mxu0 %v464_v8 }
 0x541   :  { %975 = vmatprep.mubr.msk.bf16.mxu0 %vm1105_vm0, %v1104_v0  ;;  %960 = vmatpush3.bf16.msra.mxu0 %v998_v9 }
 0x542   :  { %961 = vmatprep.subr.bf16.mxu0 %v1104_v0 }
 0x545   :  { %962 = vmatpush3.bf16.msra.mxu0 %v999_v10 }
 0x546   :  { %963 = vmatprep.subr.bf16.mxu0 %v1104_v0 }
 0x549   :  { %964 = vmatpush3.bf16.msra.mxu0 %v1000_v11 }
 0x54a   :  { %965 = vmatprep.subr.bf16.mxu0 %v1104_v0 }
 0x54d   :  { %966 = vmatpush3.bf16.msra.mxu0 %v1001_v22 }
 0x54e   :  { %967 = vmatprep.subr.bf16.mxu0 %v1104_v0 }
 0x551   :  { %968 = vmatpush3.bf16.msra.mxu0 %v1002_v23 }
 0x552   :  { %969 = vmatprep.subr.bf16.mxu0 %v1104_v0 }
 0x555   :  { %970 = vmatpush3.bf16.msra.mxu0 %v1003_v24 }
 0x556   :  { %971 = vmatprep.subr.bf16.mxu0 %v1104_v0 }
 0x559   :  { %972 = vmatpush3.bf16.msra.mxu0 %v1004_v25 }
 0x55a   :  { %973 = vmatprep.subr.bf16.mxu0 %v1104_v0 }
 0x55d   :  { %974 = vmatpush3.bf16.msra.mxu0 %v1005_v26 }
 0x600   :  { %v499_v15 = vpop.f32.mrf.mxu0 }
 0x601   :  { %v505_v16 = vadd.f32 %v499_v15, %v463_v14 }
 0x602   :  { %v937_v17 = vpop.f32.mrf.mxu0 }
 0x603   :  { %1018 = vtanh.f32 %v505_v16 }
 0x604   :  { %v502_v18 = vpop.f32.mrf.mxu0 }
 0x606   :  { %v938_v19 = vpop.f32.mrf.mxu0 }
 0x610   :  { %v1019_v20 = vpop.eup %1018 }
 0x611   :  { %v508_v21 = vpack.c.bf16 %v1019_v20, %v1019_v20 }
 0x613   :  { %956 = vmatmul.mubr.bf16.vlgmr.msra.gmra.mxu1 %v508_v21 }
 0x6d3   :  { %v543_v28 = vpop.f32.mrf.mxu1 }
 0x6d4   :  { %v549_v29 = vadd.f32 %v543_v28, %v507_v27 }
 0x6d5   :  { %v957_v30 = vpop.f32.mrf.mxu1 }
 0x6d6   :  { %1020 = vtanh.f32 %v549_v29 }
 0x6d7   :  { %v546_v31 = vpop.f32.mrf.mxu1 }
 0x6d9   :  { %v958_v32 = vpop.f32.mrf.mxu1 }
 0x6e3   :  { %v1021_v33 = vpop.eup %1020 }
 0x6e4   :  { %v551_v34 = vpack.c.bf16 %v1021_v33, %v1021_v33 }
 0x6e6   :  { %976 = vmatmul.mubr.bf16.vlgmr.msra.gmra.mxu0 %v551_v34 }
 0x7a6   :  { %v657_v36 = vpop.f32.mrf.mxu0 }
 0x7a7   :  { %v658_v37 = vadd.f32 %v709_v35, %v657_v36 }
 0x7a8   :  { %v977_v38 = vpop.f32.mrf.mxu0 }
 0x7a9   :  { %663 = vst [vmem:[%s1338_s5] sm:$0xff] %v658_v37 }
 0x7aa   :  { %v660_v0 = vpop.f32.mrf.mxu0 }
 0x7ac   :  { %v978_v39 = vpop.f32.mrf.mxu0 }
 0x7ad   :  { %668 = vsyncpa [#allocation6], 1 }
 0x7ae   :  { %669 = vsyncpa [#allocation8], 1 }

</bundles_post_ra>
